<compile_context>
chip_gen: v5e
topology: v5e:2x2
jax: 0.10.0
libtpu: 0.0.40
codegen_flags: <defaults>
</compile_context>

<pallas_src>
import jax
import jax.numpy as jnp
from jax import lax
from jax.experimental import pallas as pl
from jax.experimental.pallas import tpu as pltpu

# --- DiffGAT.__init__ defaults ------------------------------------------------
IN_FEATS = 7
HIDDEN = 32
HEADS = 4
HEAD_DIM = HIDDEN // HEADS          # 8  (GATConv out_channels per head)

NEG_SLOPE = 0.2                     # PyG GATConv LeakyReLU default
NEG_INF = -1e30


def _elu(v):
    return jnp.where(v > 0, v, jnp.exp(v) - 1.0)


def diffgat_kernel(x_ref, adj_ref, st_ref, dt_ref,
                   wenc_ref, benc_ref,
                   wgat_ref, asrc_ref, adst_ref, bgat_ref,
                   wcls_ref, bcls_ref,
                   out_ref):
    # ---------------- node encoder + ELU -------------------------------------
    h = jnp.dot(x_ref[...], wenc_ref[...],
                preferred_element_type=jnp.float32) + benc_ref[...]       # [N, HIDDEN]
    h = _elu(h)

    # ---------------- GATConv (dense per-destination softmax) ----------------
    z = jnp.dot(h, wgat_ref[...], preferred_element_type=jnp.float32)     # [N, HEADS*HEAD_DIM]

    # All-head attention logit pieces via two MXU matmuls (no XLU reductions / transposes):
    #   a_dst[:, h] = sum_d z[:, h*D+d] * att_dst[h, d]   (column per head)
    #   a_src[h, :] = sum_d z[:, h*D+d] * att_src[h, d]   (row    per head)
    a_dst = jnp.dot(z, adst_ref[...], preferred_element_type=jnp.float32)      # [N, HEADS]
    a_src = lax.dot_general(asrc_ref[...], z, (((1,), (1,)), ((), ())),
                            preferred_element_type=jnp.float32)                # [HEADS, N]

    adj_mask = adj_ref[...] > 0.0                                              # [N, N] (hoisted)
    head_outs = []
    for hd in range(HEADS):                                                    # static unroll, HEADS=4
        e = a_dst[:, hd:hd + 1] + a_src[hd:hd + 1, :]                          # e[i,j] = a_dst[i]+a_src[j]
        e = jnp.where(e > 0, e, NEG_SLOPE * e)                                 # LeakyReLU(0.2)
        e = jnp.where(adj_mask, e, NEG_INF)                                    # mask to neighbours
        m = jnp.max(e, axis=-1, keepdims=True)
        p = jnp.exp(e - m)
        inv = pl.reciprocal(jnp.sum(p, axis=-1, keepdims=True), approx=True)   # EUP, ~free
        attn = p * inv                                                         # softmax over sources
        head_outs.append(jnp.dot(attn, z[:, hd * HEAD_DIM:(hd + 1) * HEAD_DIM],
                                 preferred_element_type=jnp.float32))          # [N, D] (stays in regs)

    g = _elu(jnp.concatenate(head_outs, axis=-1) + bgat_ref[...])              # [N, HIDDEN]
    # dropout: inference mode -> identity

    # ---------------- edge classifier (reassociated, lane-dense output) ------
    # Per-node scores first: gsd[0, n] = g[n] . w_cls[:H],  gsd[1, n] = g[n] . w_cls[H:]
    gsd = lax.dot_general(wcls_ref[...], g, (((1,), (1,)), ((), ())),
                          preferred_element_type=jnp.float32)                  # [2, N]
    # Then gather per edge with transposed one-hots: logits[0,e] = gs[src[e]] + gd[dst[e]] + b
    logits = (jnp.dot(gsd[0:1, :], st_ref[...], preferred_element_type=jnp.float32)
              + jnp.dot(gsd[1:2, :], dt_ref[...], preferred_element_type=jnp.float32)
              + bcls_ref[0])                                                   # [1, E]
    out_ref[...] = 1.0 / (1.0 + jnp.exp(-logits))                              # sigmoid


def diff_gat_forward(x_t, x_t_dt, edge_index, params):
    """Forward pass matching DiffGAT.forward (x_t_dt is unused, just like in PyTorch)."""
    del x_t_dt
    N = x_t.shape[0]
    E = edge_index.shape[1]
    src, dst = edge_index[0], edge_index[1]

    # Dense structural glue (plain JAX): adjacency with self-loops + transposed one-hot gathers.
    nodes = jnp.arange(N, dtype=edge_index.dtype)
    adj = jnp.zeros((N, N), jnp.float32).at[
        jnp.concatenate([dst, nodes]), jnp.concatenate([src, nodes])].set(1.0)
    s_t = (nodes[:, None] == src[None, :]).astype(jnp.float32)            # [N, E]
    d_t = (nodes[:, None] == dst[None, :]).astype(jnp.float32)            # [N, E]

    # Kernel-friendly parameter packing (host side, free):
    #   asrc_rows [HEADS, HIDDEN]: row h holds att_src[h] in columns h*D:(h+1)*D
    #   adst_bd   [HIDDEN, HEADS]: column h holds att_dst[h] in rows h*D:(h+1)*D
    eye = jnp.eye(HEADS, dtype=jnp.float32)
    asrc_rows = (eye[:, :, None] * params["att_src"][:, None, :]).reshape(HEADS, HIDDEN)
    adst_bd = (eye[:, :, None] * params["att_dst"][:, None, :]).reshape(HEADS, HIDDEN).T
    wcls_rows = jnp.stack([params["w_cls"][:HIDDEN, 0], params["w_cls"][HIDDEN:, 0]], axis=0)  # [2, HIDDEN]
    b_cls = params["b_cls"].reshape(1)                                     # (1,) scalar, SMEM

    vmem = pl.BlockSpec(memory_space=pltpu.MemorySpace.VMEM)
    smem = pl.BlockSpec(memory_space=pltpu.MemorySpace.SMEM)

    out = pl.pallas_call(
        diffgat_kernel,
        out_shape=jax.ShapeDtypeStruct((1, E), jnp.float32),               # lane-dense output
        in_specs=[vmem] * 11 + [smem],
        out_specs=vmem,
    )(x_t.astype(jnp.float32), adj, s_t, d_t,
      params["w_enc"], params["b_enc"],
      params["w_gat"], asrc_rows, adst_bd, params["b_gat"],
      wcls_rows, b_cls)
    return out[0]                                                          # scores, shape [E]


def diff_gat_reference(x_t, x_t_dt, edge_index, params):
    """Pure-JAX reference (dense GAT), used only to validate the kernel."""
    del x_t_dt
    N = x_t.shape[0]
    src, dst = edge_index[0], edge_index[1]
    h = jax.nn.elu(x_t @ params["w_enc"] + params["b_enc"])
    z = h @ params["w_gat"]
    nodes = jnp.arange(N, dtype=edge_index.dtype)
    adj = jnp.zeros((N, N), jnp.float32).at[
        jnp.concatenate([dst, nodes]), jnp.concatenate([src, nodes])].set(1.0)
    outs = []
    for hd in range(HEADS):
        zh = z[:, hd * HEAD_DIM:(hd + 1) * HEAD_DIM]
        a_s = (zh * params["att_src"][hd]).sum(-1)
        a_d = (zh * params["att_dst"][hd]).sum(-1)
        e = a_d[:, None] + a_s[None, :]
        e = jnp.where(e > 0, e, NEG_SLOPE * e)
        e = jnp.where(adj > 0, e, NEG_INF)
        outs.append(jax.nn.softmax(e, axis=-1) @ zh)
    g = jax.nn.elu(jnp.concatenate(outs, axis=-1) + params["b_gat"])
    edge_repr = jnp.concatenate([g[src], g[dst]], axis=-1)
    logits = edge_repr @ params["w_cls"] + params["b_cls"]
    return jax.nn.sigmoid(logits)[:, 0]


def init_params(key):
    ks = jax.random.split(key, 6)

    def lin(k, fan_in, shape):
        return jax.random.normal(k, shape, jnp.float32) / jnp.sqrt(jnp.float32(fan_in))

    return dict(
        w_enc=lin(ks[0], IN_FEATS, (IN_FEATS, HIDDEN)),
        b_enc=lin(ks[1], IN_FEATS, (1, HIDDEN)),
        w_gat=lin(ks[2], HIDDEN, (HIDDEN, HEADS * HEAD_DIM)),
        att_src=lin(ks[3], HEAD_DIM, (HEADS, HEAD_DIM)),
        att_dst=lin(ks[4], HEAD_DIM, (HEADS, HEAD_DIM)),
        b_gat=jnp.zeros((1, HIDDEN), jnp.float32),
        w_cls=lin(ks[5], 2 * HIDDEN, (2 * HIDDEN, 1)),
        b_cls=jnp.zeros((1, 1), jnp.float32),
    )


if __name__ == "__main__":
    key = jax.random.PRNGKey(0)
    kx, kxd, kp = jax.random.split(key, 3)

    N, E = 16, 32
    x_t = jax.random.normal(kx, (N, IN_FEATS), jnp.float32)
    x_t_dt = jax.random.normal(kxd, (N, IN_FEATS), jnp.float32)   # unused by forward, matches PyTorch
    # Deterministic directed edges (ring + skip-2 ring), no duplicates / self-loops.
    eids = jnp.arange(E, dtype=jnp.int32)
    src = eids % N
    dst = (src + 1 + (eids // N)) % N
    edge_index = jnp.stack([src, dst])                            # [2, E]

    params = init_params(kp)

    scores = jax.block_until_ready(diff_gat_forward(x_t, x_t_dt, edge_index, params))
    ref = diff_gat_reference(x_t, x_t_dt, edge_index, params)

    assert scores.shape == (E,), scores.shape
    assert jnp.all(jnp.isfinite(scores))
    # 1e-3 tolerance: the in-kernel softmax uses the EUP approximate reciprocal.
    assert jnp.allclose(scores, ref, atol=1e-3, rtol=1e-3), (scores, ref)
    print("KERNEL_OK")
</pallas_src>

<mosaic_0001>
module attributes {stable_mosaic.version = 11 : i64} {
  func.func @diffgat_kernel(%arg0: memref<16x7xf32, #tpu.memory_space<vmem>>, %arg1: memref<16x16xf32, #tpu.memory_space<vmem>>, %arg2: memref<16x32xf32, #tpu.memory_space<vmem>>, %arg3: memref<16x32xf32, #tpu.memory_space<vmem>>, %arg4: memref<7x32xf32, #tpu.memory_space<vmem>>, %arg5: memref<1x32xf32, #tpu.memory_space<vmem>>, %arg6: memref<32x32xf32, #tpu.memory_space<vmem>>, %arg7: memref<4x32xf32, #tpu.memory_space<vmem>>, %arg8: memref<32x4xf32, #tpu.memory_space<vmem>>, %arg9: memref<1x32xf32, #tpu.memory_space<vmem>>, %arg10: memref<2x32xf32, #tpu.memory_space<vmem>>, %arg11: memref<1xf32, #tpu.memory_space<smem>>, %arg12: memref<1x32xf32, #tpu.memory_space<vmem>>) attributes {dimension_semantics = [], scalar_prefetch = 0 : i64, scratch_operands = 0 : i64, tpu.core_type = #tpu.core_type<tc>} {
    %c0 = arith.constant 0 : index
    %c0_0 = arith.constant 0 : index
    %0 = vector.load %arg0[%c0, %c0_0] : memref<16x7xf32, #tpu.memory_space<vmem>>, vector<16x7xf32>
    %c0_1 = arith.constant 0 : index
    %c0_2 = arith.constant 0 : index
    %1 = vector.load %arg4[%c0_1, %c0_2] : memref<7x32xf32, #tpu.memory_space<vmem>>, vector<7x32xf32>
    %cst = arith.constant dense<0.000000e+00> : vector<16x32xf32>
    %2 = tpu.matmul %0, %1, %cst {dimension_numbers = #tpu.dot_dimension_numbers<[1], [0], [0], [1], [0, 0, 1, 1], [], []>} : vector<16x7xf32>, vector<7x32xf32>, vector<16x32xf32> -> vector<16x32xf32>
    %c0_3 = arith.constant 0 : index
    %c0_4 = arith.constant 0 : index
    %3 = vector.load %arg5[%c0_3, %c0_4] : memref<1x32xf32, #tpu.memory_space<vmem>>, vector<1x32xf32>
    %4 = vector.broadcast %3 : vector<1x32xf32> to vector<16x32xf32>
    %5 = arith.addf %2, %4 : vector<16x32xf32>
    %cst_5 = arith.constant 0.000000e+00 : f32
    %6 = vector.broadcast %cst_5 : f32 to vector<16x32xf32>
    %7 = arith.cmpf ogt, %5, %6 : vector<16x32xf32>
    %8 = math.exp %5 : vector<16x32xf32>
    %cst_6 = arith.constant 1.000000e+00 : f32
    %9 = vector.broadcast %cst_6 : f32 to vector<16x32xf32>
    %10 = arith.subf %8, %9 : vector<16x32xf32>
    %11 = arith.select %7, %5, %10 : vector<16x32xi1>, vector<16x32xf32>
    %c0_7 = arith.constant 0 : index
    %c0_8 = arith.constant 0 : index
    %12 = vector.load %arg6[%c0_7, %c0_8] : memref<32x32xf32, #tpu.memory_space<vmem>>, vector<32x32xf32>
    %cst_9 = arith.constant dense<0.000000e+00> : vector<16x32xf32>
    %13 = tpu.matmul %11, %12, %cst_9 {dimension_numbers = #tpu.dot_dimension_numbers<[1], [0], [0], [1], [0, 0, 1, 1], [], []>} : vector<16x32xf32>, vector<32x32xf32>, vector<16x32xf32> -> vector<16x32xf32>
    %c0_10 = arith.constant 0 : index
    %c0_11 = arith.constant 0 : index
    %14 = vector.load %arg8[%c0_10, %c0_11] : memref<32x4xf32, #tpu.memory_space<vmem>>, vector<32x4xf32>
    %cst_12 = arith.constant dense<0.000000e+00> : vector<16x4xf32>
    %15 = tpu.matmul %13, %14, %cst_12 {dimension_numbers = #tpu.dot_dimension_numbers<[1], [0], [0], [1], [0, 0, 1, 1], [], []>} : vector<16x32xf32>, vector<32x4xf32>, vector<16x4xf32> -> vector<16x4xf32>
    %c0_13 = arith.constant 0 : index
    %c0_14 = arith.constant 0 : index
    %16 = vector.load %arg7[%c0_13, %c0_14] : memref<4x32xf32, #tpu.memory_space<vmem>>, vector<4x32xf32>
    %cst_15 = arith.constant dense<0.000000e+00> : vector<4x16xf32>
    %17 = tpu.matmul %16, %13, %cst_15 {dimension_numbers = #tpu.dot_dimension_numbers<[1], [1], [0], [0], [0, 0, 1, 0], [], []>} : vector<4x32xf32>, vector<16x32xf32>, vector<4x16xf32> -> vector<4x16xf32>
    %c0_16 = arith.constant 0 : index
    %c0_17 = arith.constant 0 : index
    %18 = vector.load %arg1[%c0_16, %c0_17] : memref<16x16xf32, #tpu.memory_space<vmem>>, vector<16x16xf32>
    %cst_18 = arith.constant 0.000000e+00 : f32
    %19 = vector.broadcast %cst_18 : f32 to vector<16x16xf32>
    %20 = arith.cmpf ogt, %18, %19 : vector<16x16xf32>
    %21 = vector.extract_strided_slice %15 {offsets = [0, 0], sizes = [16, 1], strides = [1, 1]} : vector<16x4xf32> to vector<16x1xf32>
    %22 = vector.extract_strided_slice %17 {offsets = [0, 0], sizes = [1, 16], strides = [1, 1]} : vector<4x16xf32> to vector<1x16xf32>
    %23 = vector.broadcast %21 : vector<16x1xf32> to vector<16x16xf32>
    %24 = vector.broadcast %22 : vector<1x16xf32> to vector<16x16xf32>
    %25 = arith.addf %23, %24 : vector<16x16xf32>
    %cst_19 = arith.constant 0.000000e+00 : f32
    %26 = vector.broadcast %cst_19 : f32 to vector<16x16xf32>
    %27 = arith.cmpf ogt, %25, %26 : vector<16x16xf32>
    %cst_20 = arith.constant 2.000000e-01 : f32
    %28 = vector.broadcast %cst_20 : f32 to vector<16x16xf32>
    %29 = arith.mulf %28, %25 : vector<16x16xf32>
    %30 = arith.select %27, %25, %29 : vector<16x16xi1>, vector<16x16xf32>
    %cst_21 = arith.constant -1.000000e+30 : f32
    %31 = vector.broadcast %cst_21 : f32 to vector<16x16xf32>
    %32 = arith.select %20, %30, %31 : vector<16x16xi1>, vector<16x16xf32>
    %cst_22 = arith.constant dense<0xFF800000> : vector<16xf32>
    %33 = vector.multi_reduction <maximumf>, %32, %cst_22 [1] : vector<16x16xf32> to vector<16xf32>
    %34 = vector.shape_cast %33 : vector<16xf32> to vector<16x1xf32>
    %35 = vector.broadcast %34 : vector<16x1xf32> to vector<16x16xf32>
    %36 = arith.subf %32, %35 : vector<16x16xf32>
    %37 = math.exp %36 : vector<16x16xf32>
    %cst_23 = arith.constant dense<0.000000e+00> : vector<16xf32>
    %38 = vector.multi_reduction <add>, %37, %cst_23 [1] : vector<16x16xf32> to vector<16xf32>
    %39 = vector.shape_cast %38 : vector<16xf32> to vector<16x1xf32>
    %40 = tpu.reciprocal %39 {approx = true} : vector<16x1xf32> -> vector<16x1xf32>
    %41 = vector.broadcast %40 : vector<16x1xf32> to vector<16x16xf32>
    %42 = arith.mulf %37, %41 : vector<16x16xf32>
    %43 = vector.extract_strided_slice %13 {offsets = [0, 0], sizes = [16, 8], strides = [1, 1]} : vector<16x32xf32> to vector<16x8xf32>
    %cst_24 = arith.constant dense<0.000000e+00> : vector<16x8xf32>
    %44 = tpu.matmul %42, %43, %cst_24 {dimension_numbers = #tpu.dot_dimension_numbers<[1], [0], [0], [1], [0, 0, 1, 1], [], []>} : vector<16x16xf32>, vector<16x8xf32>, vector<16x8xf32> -> vector<16x8xf32>
    %45 = vector.extract_strided_slice %15 {offsets = [0, 1], sizes = [16, 1], strides = [1, 1]} : vector<16x4xf32> to vector<16x1xf32>
    %46 = vector.extract_strided_slice %17 {offsets = [1, 0], sizes = [1, 16], strides = [1, 1]} : vector<4x16xf32> to vector<1x16xf32>
    %47 = vector.broadcast %45 : vector<16x1xf32> to vector<16x16xf32>
    %48 = vector.broadcast %46 : vector<1x16xf32> to vector<16x16xf32>
    %49 = arith.addf %47, %48 : vector<16x16xf32>
    %cst_25 = arith.constant 0.000000e+00 : f32
    %50 = vector.broadcast %cst_25 : f32 to vector<16x16xf32>
    %51 = arith.cmpf ogt, %49, %50 : vector<16x16xf32>
    %cst_26 = arith.constant 2.000000e-01 : f32
    %52 = vector.broadcast %cst_26 : f32 to vector<16x16xf32>
    %53 = arith.mulf %52, %49 : vector<16x16xf32>
    %54 = arith.select %51, %49, %53 : vector<16x16xi1>, vector<16x16xf32>
    %cst_27 = arith.constant -1.000000e+30 : f32
    %55 = vector.broadcast %cst_27 : f32 to vector<16x16xf32>
    %56 = arith.select %20, %54, %55 : vector<16x16xi1>, vector<16x16xf32>
    %cst_28 = arith.constant dense<0xFF800000> : vector<16xf32>
    %57 = vector.multi_reduction <maximumf>, %56, %cst_28 [1] : vector<16x16xf32> to vector<16xf32>
    %58 = vector.shape_cast %57 : vector<16xf32> to vector<16x1xf32>
    %59 = vector.broadcast %58 : vector<16x1xf32> to vector<16x16xf32>
    %60 = arith.subf %56, %59 : vector<16x16xf32>
    %61 = math.exp %60 : vector<16x16xf32>
    %cst_29 = arith.constant dense<0.000000e+00> : vector<16xf32>
    %62 = vector.multi_reduction <add>, %61, %cst_29 [1] : vector<16x16xf32> to vector<16xf32>
    %63 = vector.shape_cast %62 : vector<16xf32> to vector<16x1xf32>
    %64 = tpu.reciprocal %63 {approx = true} : vector<16x1xf32> -> vector<16x1xf32>
    %65 = vector.broadcast %64 : vector<16x1xf32> to vector<16x16xf32>
    %66 = arith.mulf %61, %65 : vector<16x16xf32>
    %67 = vector.extract_strided_slice %13 {offsets = [0, 8], sizes = [16, 8], strides = [1, 1]} : vector<16x32xf32> to vector<16x8xf32>
    %cst_30 = arith.constant dense<0.000000e+00> : vector<16x8xf32>
    %68 = tpu.matmul %66, %67, %cst_30 {dimension_numbers = #tpu.dot_dimension_numbers<[1], [0], [0], [1], [0, 0, 1, 1], [], []>} : vector<16x16xf32>, vector<16x8xf32>, vector<16x8xf32> -> vector<16x8xf32>
    %69 = vector.extract_strided_slice %15 {offsets = [0, 2], sizes = [16, 1], strides = [1, 1]} : vector<16x4xf32> to vector<16x1xf32>
    %70 = vector.extract_strided_slice %17 {offsets = [2, 0], sizes = [1, 16], strides = [1, 1]} : vector<4x16xf32> to vector<1x16xf32>
    %71 = vector.broadcast %69 : vector<16x1xf32> to vector<16x16xf32>
    %72 = vector.broadcast %70 : vector<1x16xf32> to vector<16x16xf32>
    %73 = arith.addf %71, %72 : vector<16x16xf32>
    %cst_31 = arith.constant 0.000000e+00 : f32
    %74 = vector.broadcast %cst_31 : f32 to vector<16x16xf32>
    %75 = arith.cmpf ogt, %73, %74 : vector<16x16xf32>
    %cst_32 = arith.constant 2.000000e-01 : f32
    %76 = vector.broadcast %cst_32 : f32 to vector<16x16xf32>
    %77 = arith.mulf %76, %73 : vector<16x16xf32>
    %78 = arith.select %75, %73, %77 : vector<16x16xi1>, vector<16x16xf32>
    %cst_33 = arith.constant -1.000000e+30 : f32
    %79 = vector.broadcast %cst_33 : f32 to vector<16x16xf32>
    %80 = arith.select %20, %78, %79 : vector<16x16xi1>, vector<16x16xf32>
    %cst_34 = arith.constant dense<0xFF800000> : vector<16xf32>
    %81 = vector.multi_reduction <maximumf>, %80, %cst_34 [1] : vector<16x16xf32> to vector<16xf32>
    %82 = vector.shape_cast %81 : vector<16xf32> to vector<16x1xf32>
    %83 = vector.broadcast %82 : vector<16x1xf32> to vector<16x16xf32>
    %84 = arith.subf %80, %83 : vector<16x16xf32>
    %85 = math.exp %84 : vector<16x16xf32>
    %cst_35 = arith.constant dense<0.000000e+00> : vector<16xf32>
    %86 = vector.multi_reduction <add>, %85, %cst_35 [1] : vector<16x16xf32> to vector<16xf32>
    %87 = vector.shape_cast %86 : vector<16xf32> to vector<16x1xf32>
    %88 = tpu.reciprocal %87 {approx = true} : vector<16x1xf32> -> vector<16x1xf32>
    %89 = vector.broadcast %88 : vector<16x1xf32> to vector<16x16xf32>
    %90 = arith.mulf %85, %89 : vector<16x16xf32>
    %91 = vector.extract_strided_slice %13 {offsets = [0, 16], sizes = [16, 8], strides = [1, 1]} : vector<16x32xf32> to vector<16x8xf32>
    %cst_36 = arith.constant dense<0.000000e+00> : vector<16x8xf32>
    %92 = tpu.matmul %90, %91, %cst_36 {dimension_numbers = #tpu.dot_dimension_numbers<[1], [0], [0], [1], [0, 0, 1, 1], [], []>} : vector<16x16xf32>, vector<16x8xf32>, vector<16x8xf32> -> vector<16x8xf32>
    %93 = vector.extract_strided_slice %15 {offsets = [0, 3], sizes = [16, 1], strides = [1, 1]} : vector<16x4xf32> to vector<16x1xf32>
    %94 = vector.extract_strided_slice %17 {offsets = [3, 0], sizes = [1, 16], strides = [1, 1]} : vector<4x16xf32> to vector<1x16xf32>
    %95 = vector.broadcast %93 : vector<16x1xf32> to vector<16x16xf32>
    %96 = vector.broadcast %94 : vector<1x16xf32> to vector<16x16xf32>
    %97 = arith.addf %95, %96 : vector<16x16xf32>
    %cst_37 = arith.constant 0.000000e+00 : f32
    %98 = vector.broadcast %cst_37 : f32 to vector<16x16xf32>
    %99 = arith.cmpf ogt, %97, %98 : vector<16x16xf32>
    %cst_38 = arith.constant 2.000000e-01 : f32
    %100 = vector.broadcast %cst_38 : f32 to vector<16x16xf32>
    %101 = arith.mulf %100, %97 : vector<16x16xf32>
    %102 = arith.select %99, %97, %101 : vector<16x16xi1>, vector<16x16xf32>
    %cst_39 = arith.constant -1.000000e+30 : f32
    %103 = vector.broadcast %cst_39 : f32 to vector<16x16xf32>
    %104 = arith.select %20, %102, %103 : vector<16x16xi1>, vector<16x16xf32>
    %cst_40 = arith.constant dense<0xFF800000> : vector<16xf32>
    %105 = vector.multi_reduction <maximumf>, %104, %cst_40 [1] : vector<16x16xf32> to vector<16xf32>
    %106 = vector.shape_cast %105 : vector<16xf32> to vector<16x1xf32>
    %107 = vector.broadcast %106 : vector<16x1xf32> to vector<16x16xf32>
    %108 = arith.subf %104, %107 : vector<16x16xf32>
    %109 = math.exp %108 : vector<16x16xf32>
    %cst_41 = arith.constant dense<0.000000e+00> : vector<16xf32>
    %110 = vector.multi_reduction <add>, %109, %cst_41 [1] : vector<16x16xf32> to vector<16xf32>
    %111 = vector.shape_cast %110 : vector<16xf32> to vector<16x1xf32>
    %112 = tpu.reciprocal %111 {approx = true} : vector<16x1xf32> -> vector<16x1xf32>
    %113 = vector.broadcast %112 : vector<16x1xf32> to vector<16x16xf32>
    %114 = arith.mulf %109, %113 : vector<16x16xf32>
    %115 = vector.extract_strided_slice %13 {offsets = [0, 24], sizes = [16, 8], strides = [1, 1]} : vector<16x32xf32> to vector<16x8xf32>
    %cst_42 = arith.constant dense<0.000000e+00> : vector<16x8xf32>
    %116 = tpu.matmul %114, %115, %cst_42 {dimension_numbers = #tpu.dot_dimension_numbers<[1], [0], [0], [1], [0, 0, 1, 1], [], []>} : vector<16x16xf32>, vector<16x8xf32>, vector<16x8xf32> -> vector<16x8xf32>
    %117 = tpu.concatenate %44, %68, %92, %116 in 1 : vector<16x8xf32>, vector<16x8xf32>, vector<16x8xf32>, vector<16x8xf32> -> vector<16x32xf32>
    %c0_43 = arith.constant 0 : index
    %c0_44 = arith.constant 0 : index
    %118 = vector.load %arg9[%c0_43, %c0_44] : memref<1x32xf32, #tpu.memory_space<vmem>>, vector<1x32xf32>
    %119 = vector.broadcast %118 : vector<1x32xf32> to vector<16x32xf32>
    %120 = arith.addf %117, %119 : vector<16x32xf32>
    %cst_45 = arith.constant 0.000000e+00 : f32
    %121 = vector.broadcast %cst_45 : f32 to vector<16x32xf32>
    %122 = arith.cmpf ogt, %120, %121 : vector<16x32xf32>
    %123 = math.exp %120 : vector<16x32xf32>
    %cst_46 = arith.constant 1.000000e+00 : f32
    %124 = vector.broadcast %cst_46 : f32 to vector<16x32xf32>
    %125 = arith.subf %123, %124 : vector<16x32xf32>
    %126 = arith.select %122, %120, %125 : vector<16x32xi1>, vector<16x32xf32>
    %c0_47 = arith.constant 0 : index
    %c0_48 = arith.constant 0 : index
    %127 = vector.load %arg10[%c0_47, %c0_48] : memref<2x32xf32, #tpu.memory_space<vmem>>, vector<2x32xf32>
    %cst_49 = arith.constant dense<0.000000e+00> : vector<2x16xf32>
    %128 = tpu.matmul %127, %126, %cst_49 {dimension_numbers = #tpu.dot_dimension_numbers<[1], [1], [0], [0], [0, 0, 1, 0], [], []>} : vector<2x32xf32>, vector<16x32xf32>, vector<2x16xf32> -> vector<2x16xf32>
    %129 = vector.extract_strided_slice %128 {offsets = [0, 0], sizes = [1, 16], strides = [1, 1]} : vector<2x16xf32> to vector<1x16xf32>
    %c0_50 = arith.constant 0 : index
    %c0_51 = arith.constant 0 : index
    %130 = vector.load %arg2[%c0_50, %c0_51] : memref<16x32xf32, #tpu.memory_space<vmem>>, vector<16x32xf32>
    %cst_52 = arith.constant dense<0.000000e+00> : vector<1x32xf32>
    %131 = tpu.matmul %129, %130, %cst_52 {dimension_numbers = #tpu.dot_dimension_numbers<[1], [0], [0], [1], [0, 0, 1, 1], [], []>} : vector<1x16xf32>, vector<16x32xf32>, vector<1x32xf32> -> vector<1x32xf32>
    %132 = vector.extract_strided_slice %128 {offsets = [1, 0], sizes = [1, 16], strides = [1, 1]} : vector<2x16xf32> to vector<1x16xf32>
    %c0_53 = arith.constant 0 : index
    %c0_54 = arith.constant 0 : index
    %133 = vector.load %arg3[%c0_53, %c0_54] : memref<16x32xf32, #tpu.memory_space<vmem>>, vector<16x32xf32>
    %cst_55 = arith.constant dense<0.000000e+00> : vector<1x32xf32>
    %134 = tpu.matmul %132, %133, %cst_55 {dimension_numbers = #tpu.dot_dimension_numbers<[1], [0], [0], [1], [0, 0, 1, 1], [], []>} : vector<1x16xf32>, vector<16x32xf32>, vector<1x32xf32> -> vector<1x32xf32>
    %135 = arith.addf %131, %134 : vector<1x32xf32>
    %c0_56 = arith.constant 0 : index
    %136 = memref.load %arg11[%c0_56] : memref<1xf32, #tpu.memory_space<smem>>
    %137 = vector.broadcast %136 : f32 to vector<1x32xf32>
    %138 = arith.addf %135, %137 : vector<1x32xf32>
    %cst_57 = arith.constant 0.000000e+00 : f32
    %139 = vector.broadcast %cst_57 : f32 to vector<1x32xf32>
    %140 = arith.subf %139, %138 : vector<1x32xf32>
    %141 = math.exp %140 : vector<1x32xf32>
    %cst_58 = arith.constant 1.000000e+00 : f32
    %142 = vector.broadcast %cst_58 : f32 to vector<1x32xf32>
    %143 = arith.addf %142, %141 : vector<1x32xf32>
    %cst_59 = arith.constant 1.000000e+00 : f32
    %144 = vector.broadcast %cst_59 : f32 to vector<1x32xf32>
    %145 = arith.divf %144, %143 : vector<1x32xf32>
    %c0_60 = arith.constant 0 : index
    %c0_61 = arith.constant 0 : index
    %146 = vector.load %arg12[%c0_60, %c0_61] : memref<1x32xf32, #tpu.memory_space<vmem>>, vector<1x32xf32>
    tpu.vector_store %arg12[%c0_60, %c0_61], %145 {strides = array<i32>} : memref<1x32xf32, #tpu.memory_space<vmem>>, vector<1x32xf32>,
    return
  }
}

</mosaic_0001>

<bundles_post_ra>
// kernel: tpu_custom_call.1
= control target key start
LH: loop header
LB: loop body
LE: loop exit
PB: predicated region body
PF: predicated region fallthrough
CT: control target
= control target key end

     0   :  { %18 = vsyncpa [#allocation4], 0  ;;  %s1148_s0 = inlined_call_operand.vmem [shape: f32[16,7], index: 0, kind: input, shape index: {}]   ;;  %s1149_s1 = inlined_call_operand.vmem [shape: f32[16,16], index: 1, kind: input, shape index: {}]   ;;  %s1150_s2 = inlined_call_operand.hbm [shape: f32[16,32], index: 2, kind: input, shape index: {}]   ;;  %s1151_s3 = inlined_call_operand.hbm [shape: f32[16,32], index: 3, kind: input, shape index: {}]   ;;  %s1152_s4 = inlined_call_operand.vmem [shape: f32[7,32], index: 4, kind: input, shape index: {}]   ;;  %s1153_s5 = inlined_call_operand.hbm [shape: f32[1,32], index: 5, kind: input, shape index: {}]   ;;  %s1154_s6 = inlined_call_operand.vmem [shape: f32[32,32], index: 6, kind: input, shape index: {}]   ;;  %s1155_s7 = inlined_call_operand.vmem [shape: f32[4,32], index: 7, kind: input, shape index: {}]   ;;  %s1156_s8 = inlined_call_operand.vmem [shape: f32[32,4], index: 8, kind: input, shape index: {}]   ;;  %s1157_s9 = inlined_call_operand.vmem [shape: f32[1,32], index: 9, kind: input, shape index: {}]   ;;  %s1158_s10 = inlined_call_operand.vmem [shape: f32[2,32], index: 10, kind: input, shape index: {}]   ;;  %s1159_s11 = inlined_call_operand.<no memory space> [shape: f32[1], index: 11, kind: input, shape index: {}]   ;;  %s1160_s12 = inlined_call_operand.hbm [shape: f32[1,32], index: 12, kind: output, shape index: {}]  }
   0x1   :  { %19 = vsyncpa [#allocation7], 0 }
   0x2   :  { %20 = vsyncpa [#allocation5], 0  ;;  %s42_s23 = sshll.u32 %s1151_s3, 4  ;;  %s919_s24 = smov [#allocation6]   ;;  %s43_s23 = int_to_ptr.hbm [resolvable:$true] %s42_s23 }
   0x3   :  { %s44_s25 = sshll.u32 %s919_s24, 4  ;;  %s29_s28 = sshll.u32 %s1150_s2, 4  ;;  %s45_s25 = int_to_ptr.vmem [resolvable:$true] %s44_s25  ;;  %s30_s28 = int_to_ptr.hbm [resolvable:$true] %s29_s28 }
   0x4   :  { %s920_s29 = smov 128   ;;  %s921_s30 = smov 8  }
   0x5   :  { %50 = dma.hbm_to_vmem [thread:$0]  %s43_s23, 256, %s45_s25, [#allocation7], %s920_s29, %s920_s29, %s921_s30  }
   0x6   :  { %s922_s13 = smov [#allocation3]   ;;  %s58_s17 = sshll.u32 %s1153_s5, 4  ;;  %s59_s17 = int_to_ptr.hbm [resolvable:$true] %s58_s17 }
   0x7   :  { %s31_s14 = sshll.u32 %s922_s13, 4  ;;  %s923_s3 = smov [#allocation8]   ;;  %s32_s14 = int_to_ptr.vmem [resolvable:$true] %s31_s14 }
   0x8   :  { %37 = dma.hbm_to_vmem [thread:$0]  %s30_s28, 256, %s32_s14, [#allocation4], %s920_s29, %s920_s29, %s921_s30  }
   0x9   :  { %s60_s18 = sshll.u32 %s923_s3, 4  ;;  %s61_s18 = int_to_ptr.vmem [resolvable:$true] %s60_s18 }
   0xa   :  { %63 = dma.hbm_to_vmem [thread:$0]  %s59_s17, 16, %s61_s18, [#allocation7]  }
   0xb   :  { %913 = dma.done.wait [#allocation4], 256  }
   0xc   :  { %914 = vsyncadd [#allocation4], 4294967040 }
   0xd   :  { %915 = dma.done.wait [#allocation7], 272  }
   0xe   :  { %916 = vsyncadd [#allocation7], 4294967024  ;;  %vm102_vm0 = vcmask 1046528   ;;  %vm95_vm1 = vcmask 56320   ;;  %v90_v0 = vld [vmem:[%s1152_s4] sm:$0x7f] }
   0xf   :  { %v88_v1 = vld [vmem:[%s1148_s0] sm:$0xff]  ;;  %705 = vmatpush.msk.msra.mxu0 %vm102_vm0, %v90_v0  ;;  %v89_v2 = vld [vmem:[%s1148_s0 + $0x8] sm:$0xff]  ;;  %v142_v3 = vld [vmem:[%s1154_s6 + $0x18] sm:$0xff]  ;;  %vm143_vm2 = vcmask 261120   ;;  %v924_v24 = vmov 3   ;;  %v925_v25 = vmov 2  }
  0x10   :  { %706 = vmatmul.msk.f32.vlgmr.msra.gmra.mxu0 %vm95_vm1, %v88_v1  ;;  %162 = vmatpush.msra.mxu1 %v142_v3  ;;  %v141_v4 = vld [vmem:[%s1154_s6 + $0x10] sm:$0xff]  ;;  %v140_v5 = vld [vmem:[%s1154_s6 + $0x8] sm:$0xff]  ;;  %v139_v6 = vld [vmem:[%s1154_s6] sm:$0xff]  ;;  %v926_v29 = vmov 1   ;;  %v927_v32 = vmov 0   ;;  %vm255_vm8 = vcmask 130048  }
  0x11   :  { %v176_v7 = vld [vmem:[%s1156_s8 + $0x18] sm:$0xff]  ;;  %v175_v8 = vld [vmem:[%s1156_s8 + $0x10] sm:$0xff]  ;;  %v174_v9 = vld [vmem:[%s1156_s8 + $0x8] sm:$0xff]  ;;  %747 = vset.pattern.permute.xlu0 %v924_v24  ;;  %749 = vset.pattern.permute.xlu1 %v925_v25  ;;  %s929_s5 = smov 104   ;;  %s930_s21 = smov 112   ;;  %vm559_vm0 = vcmask 64512  }
  0x12   :  { %163 = vmatpush.msra.mxu1 %v141_v4  ;;  %195 = vmatpush.msra.mxu2 %v176_v7  ;;  %v771_v10 = vld [vmem:[#allocation8] ss:$0 sm:$0xff]  ;;  %v231_v49 = vld [vmem:[%s1149_s1 + $0x8] sm:$0xff]  ;;  %s931_s22 = smov 24   ;;  %s932_s23 = smov 16  }
  0x13   :  { %v173_v23 = vld [vmem:[%s1156_s8] sm:$0xff]  ;;  %752 = vset.pattern.permute.xlu2 %v926_v29  ;;  %vm233_vm10 = vcmp.gt.f32.partialorder %v231_v49, 0.0 }
  0x14   :  { %164 = vmatpush.msra.mxu1 %v140_v5  ;;  %196 = vmatpush.msra.mxu2 %v175_v8  ;;  %v206_v28 = vld [vmem:[%s1155_s7] sm:$0xf] }
  0x15   :  { %v230_v39 = vld [vmem:[%s1149_s1] sm:$0xff]  ;;  %s928_s1 = smov 120  }
  0x16   :  { %165 = vmatpush.msra.mxu1 %v139_v6  ;;  %197 = vmatpush.msra.mxu2 %v174_v9  ;;  %vm232_vm5 = vcmp.gt.f32.partialorder %v230_v39, 0.0 }
  0x18   :  { %707 = vmatmul.msk.f32.gmra.mxu0 %vm95_vm1, %v89_v2  ;;  %198 = vmatpush.msra.mxu2 %v173_v23  ;;  %vm564_vm1 = vcmask 195584  }
  0x8d   :  { %v123_v11 = vpop.f32.mrf.mxu0 }
  0x8e   :  { %v124_v12 = vadd.f32 %v771_v10, %v123_v11 }
  0x90   :  { %v131_v13 = vmul.f32 1.442695, %v124_v12  ;;  %vm129_vm3 = vcmp.gt.f32.partialorder %v124_v12, 0.0 }
  0x92   :  { %773 = vpow2.f32 %v131_v13 }
  0x95   :  { %v126_v14 = vpop.f32.mrf.mxu0 }
  0x96   :  { %v127_v15 = vadd.f32 %v771_v10, %v126_v14 }
  0x98   :  { %v774_v16 = vpop.eup %773  ;;  %v133_v17 = vmul.f32 1.442695, %v127_v15  ;;  %vm130_vm4 = vcmp.gt.f32.partialorder %v127_v15, 0.0 }
  0x99   :  { %v708_v18 = vadd.f32 -1.0, %v774_v16 }
  0x9a   :  { %775 = vpow2.f32 %v133_v17 }
  0x9b   :  { %v137_v19 = vsel %vm129_vm3, %v124_v12, %v708_v18 }
  0x9c   :  { %710 = vmatmul.msk.f32.vlgmr.msra.gmra.mxu1 %vm143_vm2, %v137_v19 }
  0xa0   :  { %v776_v20 = vpop.eup %775 }
  0xa1   :  { %v709_v21 = vadd.f32 -1.0, %v776_v20 }
  0xa3   :  { %v138_v22 = vsel %vm130_vm4, %v127_v15, %v709_v21 }
  0xa4   :  { %711 = vmatmul.msk.f32.gmra.mxu1 %vm143_vm2, %v138_v22 }
 0x119   :  { %v1045_v26 = vpop.f32.mrf.mxu1 }
 0x11a   :  { %712 = vmatmul.msk.f32.vlgmr.msra.gmra.mxu2 %vm143_vm2, %v1045_v26 }
 0x121   :  { %v1049_v27 = vpop.f32.mrf.mxu1 }
 0x122   :  { %713 = vmatmul.msk.f32.gmra.mxu2 %vm143_vm2, %v1049_v27  ;;  %714 = vmatpush.xpose.msk.msra.mxu3 %vm143_vm2, %v1049_v27 }
 0x126   :  { %715 = vmatpush.xpose.msk.msra.mxu3 %vm143_vm2, %v1045_v26 }
 0x129   :  { %716 = vmatmul.msk.f32.vlgmr.msra.gmra.mxu3 %vm143_vm2, %v206_v28 }
 0x12a   :  { %298 = vmatpush.msrb.mxu3 %v1049_v27 }
 0x12c   :  { %299 = vmatpush.msrb.mxu3 %v1045_v26 }
 0x19d   :  { %v200_v30 = vpop.f32.mrf.mxu2 }
 0x19e   :  { %384 = vperm.xlu1 %749, %v200_v30   ;;  %460 = vperm.xlu0 %747, %v200_v30  }
 0x1a5   :  { %v203_v31 = vpop.f32.mrf.mxu2 }
 0x1a6   :  { %750 = vset.pattern.permute.xlu1 %v927_v32  ;;  %748 = vset.pattern.permute.xlu0 %v926_v29 }
 0x1a7   :  { %312 = vperm.xlu2 %752, %v203_v31   ;;  %236 = vperm.xlu1 %750, %v200_v30  }
 0x1a8   :  { %308 = vperm.xlu0 %748, %v200_v30  }
 0x1ac   :  { %v227_v34 = vpop.f32.mrf.mxu3 }
 0x1ad   :  { %v467_v36 = vperm.slane %v227_v34, 3  ;;  %v315_v37 = vperm.slane %v227_v34, 1  ;;  %v391_v38 = vperm.slane %v227_v34, 2  ;;  %v244_v54 = vperm.slane %v227_v34, 0 }
 0x1af   :  { %753 = vset.pattern.permute.xlu2 %v925_v25  ;;  %751 = vset.pattern.permute.xlu1 %v924_v24 }
 0x1b0   :  { %388 = vperm.xlu2 %753, %v203_v31   ;;  %464 = vperm.xlu1 %751, %v203_v31  }
 0x1b1   :  { %770 = vset.pattern.permute.xlu0 %v924_v24 }
 0x1b8   :  { %754 = vset.pattern.permute.xlu2 %v927_v32 }
 0x1b9   :  { %241 = vperm.xlu2 %754, %v203_v31  }
 0x201   :  { %v313_v33 = vpop.permute.xlu2 %312 }
 0x202   :  { %v317_v44 = vadd.f32 %v315_v37, %v313_v33 }
 0x204   :  { %v321_v50 = vmul.f32 0.2, %v317_v44  ;;  %vm319_vm9 = vcmp.gt.f32.partialorder %v317_v44, 0.0 }
 0x206   :  { %v323_v59 = vsel %vm319_vm9, %v317_v44, %v321_v50  ;;  %v760_v50 = vpack.i.bf16 %v1045_v26, %v1049_v27 }
 0x207   :  { %v325_v1 = vsel %vm233_vm10, %v323_v59, -1e+30 }
 0x208   :  { %v329_v5 = vsel %vm255_vm8, %v325_v1, -inf }
 0x20a   :  { %v389_v35 = vpop.permute.xlu2 %388 }
 0x20b   :  { %v393_v62 = vadd.f32 %v391_v38, %v389_v35 }
 0x20d   :  { %v397_v8 = vmul.f32 0.2, %v393_v62  ;;  %vm395_vm14 = vcmp.gt.f32.partialorder %v393_v62, 0.0 }
 0x20f   :  { %v399_v15 = vsel %vm395_vm14, %v393_v62, %v397_v8 }
 0x210   :  { %v385_v40 = vpop.permute.xlu1 %384  ;;  %v461_v41 = vpop.permute.xlu0 %460  ;;  %v401_v18 = vsel %vm233_vm10, %v399_v15, -1e+30 }
 0x211   :  { %v392_v42 = vadd.f32 %v391_v38, %v385_v40  ;;  %v468_v43 = vadd.f32 %v467_v36, %v461_v41  ;;  %v405_v22 = vsel %vm255_vm8, %v401_v18, -inf }
 0x213   :  { %v396_v45 = vmul.f32 0.2, %v392_v42  ;;  %v472_v46 = vmul.f32 0.2, %v468_v43  ;;  %vm470_vm6 = vcmp.gt.f32.partialorder %v468_v43, 0.0  ;;  %vm394_vm7 = vcmp.gt.f32.partialorder %v392_v42, 0.0  ;;  %v242_v51 = vpop.permute.xlu2 %241 }
 0x214   :  { %v246_v57 = vadd.f32 %v244_v54, %v242_v51 }
 0x215   :  { %v474_v47 = vsel %vm470_vm6, %v468_v43, %v472_v46  ;;  %v398_v48 = vsel %vm394_vm7, %v392_v42, %v396_v45  ;;  %vm685_vm7 = vcmask 253952  }
 0x216   :  { %v476_v52 = vsel %vm232_vm5, %v474_v47, -1e+30  ;;  %v400_v53 = vsel %vm232_vm5, %v398_v48, -1e+30  ;;  %v250_v2 = vmul.f32 0.2, %v246_v57 }
 0x217   :  { %v478_v55 = vsel %vm255_vm8, %v476_v52, -inf  ;;  %v402_v56 = vsel %vm255_vm8, %v400_v53, -inf  ;;  %vm248_vm13 = vcmp.gt.f32.partialorder %v246_v57, 0.0 }
 0x218   :  { %479 = vmax.xlane.f32.xlu0 %v478_v55  ;;  %403 = vmax.xlane.f32.xlu2 %v402_v56  ;;  %v252_v12 = vsel %vm248_vm13, %v246_v57, %v250_v2 }
 0x219   :  { %v237_v58 = vpop.permute.xlu1 %236  ;;  %v1083_v16 = vsel %vm233_vm10, %v252_v12, -1e+30 }
 0x21a   :  { %v245_v60 = vadd.f32 %v244_v54, %v237_v58  ;;  %v309_v61 = vpop.permute.xlu0 %308  ;;  %v259_v19 = vsel %vm255_vm8, %v1083_v16, -inf }
 0x21b   :  { %v316_v63 = vadd.f32 %v315_v37, %v309_v61 }
 0x21c   :  { %v249_v0 = vmul.f32 0.2, %v245_v60  ;;  %vm247_vm11 = vcmp.gt.f32.partialorder %v245_v60, 0.0 }
 0x21d   :  { %v320_v3 = vmul.f32 0.2, %v316_v63  ;;  %vm318_vm12 = vcmp.gt.f32.partialorder %v316_v63, 0.0 }
 0x21e   :  { %v251_v4 = vsel %vm247_vm11, %v245_v60, %v249_v0 }
 0x21f   :  { %v1076_v6 = vsel %vm232_vm5, %v251_v4, -1e+30  ;;  %v322_v7 = vsel %vm318_vm12, %v316_v63, %v320_v3 }
 0x220   :  { %330 = vmax.xlane.f32.xlu0 %v329_v5  ;;  %v256_v9 = vsel %vm255_vm8, %v1076_v6, -inf  ;;  %v324_v10 = vsel %vm232_vm5, %v322_v7, -1e+30 }
 0x221   :  { %257 = vmax.xlane.f32.xlu2 %v256_v9  ;;  %v326_v11 = vsel %vm255_vm8, %v324_v10, -inf }
 0x222   :  { %327 = vmax.xlane.f32.xlu1 %v326_v11  ;;  %v465_v13 = vpop.permute.xlu1 %464 }
 0x223   :  { %v469_v14 = vadd.f32 %v467_v36, %v465_v13 }
 0x225   :  { %v473_v17 = vmul.f32 0.2, %v469_v14  ;;  %vm471_vm15 = vcmp.gt.f32.partialorder %v469_v14, 0.0 }
 0x227   :  { %v475_v20 = vsel %vm471_vm15, %v469_v14, %v473_v17 }
 0x228   :  { %260 = vmax.xlane.f32.xlu0 %v259_v19  ;;  %v477_v21 = vsel %vm233_vm10, %v475_v20, -1e+30 }
 0x229   :  { %v481_v23 = vsel %vm255_vm8, %v477_v21, -inf }
 0x22a   :  { %406 = vmax.xlane.f32.xlu1 %v405_v22  ;;  %482 = vmax.xlane.f32.xlu2 %v481_v23 }
 0x28b   :  { %v480_v24 = vpop.xlane.xlu0 %479  ;;  %v404_v25 = vpop.xlane.xlu2 %403 }
 0x28c   :  { %v484_v28 = vsub.f32 %v476_v52, %v480_v24  ;;  %v408_v29 = vsub.f32 %v400_v53, %v404_v25 }
 0x28e   :  { %v486_v30 = vmul.f32 1.442695, %v484_v28  ;;  %v410_v31 = vmul.f32 1.442695, %v408_v29 }
 0x290   :  { %777 = vpow2.f32 %v486_v30 }
 0x291   :  { %779 = vpow2.f32 %v410_v31 }
 0x293   :  { %v331_v41 = vpop.xlane.xlu0 %330 }
 0x294   :  { %v258_v32 = vpop.xlane.xlu2 %257  ;;  %v333_v45 = vsub.f32 %v325_v1, %v331_v41 }
 0x295   :  { %v328_v33 = vpop.xlane.xlu1 %327  ;;  %v262_v53 = vsub.f32 %v1076_v6, %v258_v32 }
 0x296   :  { %v1091_v34 = vpop.eup %777  ;;  %v332_v35 = vsub.f32 %v324_v10, %v328_v33  ;;  %v336_v47 = vmul.f32 1.442695, %v333_v45  ;;  %v772_v45 = vld [vmem:[%s1157_s9] ss:$0 sm:$0xff] }
 0x297   :  { %v1093_v36 = vpop.eup %779  ;;  %v490_v37 = vsel %vm255_vm8, %v1091_v34, 0.0  ;;  %v264_v55 = vmul.f32 1.442695, %v262_v53  ;;  %v614_v53 = vld [vmem:[#allocation3 + $0x8] sm:$0xff] }
 0x298   :  { %v334_v38 = vmul.f32 1.442695, %v332_v35  ;;  %v414_v39 = vsel %vm255_vm8, %v1093_v36, 0.0  ;;  %491 = vadd.xlane.f32.xlu1 %v490_v37 }
 0x299   :  { %415 = vadd.xlane.f32.xlu0 %v414_v39 }
 0x29a   :  { %781 = vpow2.f32 %v334_v38 }
 0x29b   :  { %v261_v60 = vpop.xlane.xlu0 %260 }
 0x29c   :  { %v263_v61 = vsub.f32 %v1083_v16, %v261_v60 }
 0x29d   :  { %v483_v40 = vpop.xlane.xlu2 %482  ;;  %v407_v54 = vpop.xlane.xlu1 %406 }
 0x29e   :  { %v485_v42 = vsub.f32 %v477_v21, %v483_v40  ;;  %v409_v56 = vsub.f32 %v401_v18, %v407_v54  ;;  %v266_v62 = vmul.f32 1.442695, %v263_v61 }
 0x2a0   :  { %v782_v43 = vpop.eup %781  ;;  %v488_v44 = vmul.f32 1.442695, %v485_v42  ;;  %v412_v57 = vmul.f32 1.442695, %v409_v56 }
 0x2a1   :  { %v338_v46 = vsel %vm255_vm8, %v782_v43, 0.0 }
 0x2a2   :  { %339 = vadd.xlane.f32.xlu2 %v338_v46  ;;  %783 = vpow2.f32 %v488_v44 }
 0x2a3   :  { %785 = vpow2.f32 %v336_v47 }
 0x2a4   :  { %787 = vpow2.f32 %v264_v55 }
 0x2a5   :  { %789 = vpow2.f32 %v412_v57 }
 0x2a6   :  { %791 = vpow2.f32 %v266_v62 }
 0x2a8   :  { %v1100_v48 = vpop.eup %783 }
 0x2a9   :  { %v493_v49 = vsel %vm255_vm8, %v1100_v48, 0.0  ;;  %v786_v51 = vpop.eup %785 }
 0x2aa   :  { %494 = vadd.xlane.f32.xlu2 %v493_v49  ;;  %v341_v52 = vsel %vm255_vm8, %v786_v51, 0.0  ;;  %v788_v58 = vpop.eup %787 }
 0x2ab   :  { %v268_v26 = vsel %vm255_vm8, %v788_v58, 0.0  ;;  %v790_v27 = vpop.eup %789 }
 0x2ac   :  { %v417_v59 = vsel %vm255_vm8, %v790_v27, 0.0  ;;  %v792_v63 = vpop.eup %791 }
 0x2ad   :  { %761 = vrot.lane.b32.xlu0 %v760_v50, %s928_s1  ;;  %v271_v0 = vsel %vm255_vm8, %v792_v63, 0.0 }
 0x2b1   :  { %756 = vrot.lane.b32.xlu1 %v760_v50, %s929_s5 }
 0x2b2   :  { %342 = vadd.xlane.f32.xlu2 %v341_v52  ;;  %v616_v52 = vld [vmem:[#allocation6 + $0x8] sm:$0xff] }
 0x2ca   :  { %766 = vrot.lane.b32.xlu2 %v760_v50, %s930_s21 }
 0x2d7   :  { %269 = vadd.xlane.f32.xlu0 %v268_v26 }
 0x2db   :  { %418 = vadd.xlane.f32.xlu1 %v417_v59 }
 0x2f3   :  { %272 = vadd.xlane.f32.xlu2 %v271_v0 }
 0x30b   :  { %v492_v3 = vpop.xlane.xlu1 %491 }
 0x30c   :  { %v416_v2 = vpop.xlane.xlu0 %415 }
 0x315   :  { %v340_v1 = vpop.xlane.xlu2 %339 }
 0x316   :  { %793 = vrcp.f32 %v340_v1 }
 0x317   :  { %795 = vrcp.f32 %v492_v3  ;;  %v583_v3 = vld [vmem:[%s1158_s10] sm:$0x3]  ;;  %s933_s10 = smov [#allocation9]  }
 0x318   :  { %s692_s27 = sshll.u32 %s933_s10, 4  ;;  %s693_s27 = int_to_ptr.vmem [resolvable:$true] %s692_s27 }
 0x31c   :  { %v794_v6 = vpop.eup %793 }
 0x31d   :  { %v495_v4 = vpop.xlane.xlu2 %494  ;;  %v346_v10 = vmul.f32 %v794_v6, %v782_v43  ;;  %v796_v11 = vpop.eup %795 }
 0x31e   :  { %797 = vrcp.f32 %v495_v4  ;;  %v498_v15 = vmul.f32 %v796_v11, %v1091_v34  ;;  %v615_v4 = vld [vmem:[#allocation6] sm:$0xff] }
 0x31f   :  { %v762_v5 = vpop.permute.xlu0 %761 }
 0x320   :  { %v763_v7 = vunpack.i.l.bf16 %v762_v5  ;;  %v764_v8 = vunpack.i.h.bf16 %v762_v5  ;;  %v613_v5 = vld [vmem:[#allocation3] sm:$0xff] }
 0x322   :  { %374 = vmatpush.msrb.mxu0 %v763_v7 }
 0x323   :  { %v757_v9 = vpop.permute.xlu1 %756 }
 0x324   :  { %375 = vmatpush.msrb.mxu0 %v764_v8  ;;  %v758_v12 = vunpack.i.l.bf16 %v757_v9  ;;  %v759_v14 = vunpack.i.h.bf16 %v757_v9  ;;  %v798_v16 = vpop.eup %797 }
 0x325   :  { %719 = vmatmul.msk.f32.vlgmr.msrb.gmra.mxu0 %vm255_vm8, %v346_v10  ;;  %v343_v13 = vpop.xlane.xlu2 %342  ;;  %v499_v22 = vmul.f32 %v798_v16, %v1100_v48  ;;  %v664_v10 = vstv %s1159_s11  ;;  %s694_s11 = sshll.u32 %s1160_s12, 4  ;;  %s695_s11 = int_to_ptr.hbm [resolvable:$true] %s694_s11 }
 0x326   :  { %526 = vmatpush.msrb.mxu2 %v758_v12  ;;  %799 = vrcp.f32 %v343_v13  ;;  %635 = vmatpush.msra.mxu0 %v616_v52 }
 0x327   :  { %801 = vrcp.f32 %v416_v2 }
 0x328   :  { %527 = vmatpush.msrb.mxu2 %v759_v14  ;;  %636 = vmatpush.msra.mxu0 %v615_v4 }
 0x329   :  { %723 = vmatmul.msk.f32.vlgmr.msrb.gmra.mxu2 %vm255_vm8, %v498_v15 }
 0x32c   :  { %v800_v17 = vpop.eup %799 }
 0x32d   :  { %v767_v18 = vpop.permute.xlu2 %766  ;;  %v347_v19 = vmul.f32 %v800_v17, %v786_v51  ;;  %v802_v20 = vpop.eup %801 }
 0x32e   :  { %v768_v21 = vunpack.i.l.bf16 %v767_v18  ;;  %v769_v23 = vunpack.i.h.bf16 %v767_v18  ;;  %v422_v24 = vmul.f32 %v802_v20, %v1093_v36 }
 0x32f   :  { %720 = vmatmul.msk.f32.gmra.mxu0 %vm255_vm8, %v347_v19 }
 0x330   :  { %450 = vmatpush.msrb.mxu1 %v768_v21 }
 0x331   :  { %724 = vmatmul.msk.f32.gmra.mxu2 %vm255_vm8, %v499_v22 }
 0x332   :  { %451 = vmatpush.msrb.mxu1 %v769_v23 }
 0x333   :  { %721 = vmatmul.msk.f32.vlgmr.msrb.gmra.mxu1 %vm255_vm8, %v422_v24 }
 0x334   :  { %657 = vmatpush.msra.mxu1 %v614_v53 }
 0x336   :  { %658 = vmatpush.msra.mxu1 %v613_v5 }
 0x34a   :  { %v270_v25 = vpop.xlane.xlu0 %269 }
 0x34b   :  { %803 = vrcp.f32 %v270_v25 }
 0x34e   :  { %v419_v28 = vpop.xlane.xlu1 %418 }
 0x34f   :  { %805 = vrcp.f32 %v419_v28 }
 0x351   :  { %v804_v29 = vpop.eup %803 }
 0x352   :  { %v276_v30 = vmul.f32 %v804_v29, %v788_v58 }
 0x354   :  { %717 = vmatmul.msk.f32.vlgmr.msrb.gmra.mxu3 %vm255_vm8, %v276_v30 }
 0x355   :  { %v806_v31 = vpop.eup %805 }
 0x356   :  { %v423_v32 = vmul.f32 %v806_v31, %v790_v27 }
 0x358   :  { %722 = vmatmul.msk.f32.gmra.mxu1 %vm255_vm8, %v423_v32 }
 0x366   :  { %v273_v33 = vpop.xlane.xlu2 %272 }
 0x367   :  { %807 = vrcp.f32 %v273_v33 }
 0x36d   :  { %v808_v34 = vpop.eup %807 }
 0x36e   :  { %v277_v35 = vmul.f32 %v808_v34, %v792_v63 }
 0x370   :  { %718 = vmatmul.msk.f32.gmra.mxu3 %vm255_vm8, %v277_v35 }
 0x3a2   :  { %v377_v36 = vpop.f32.mrf.mxu0 }
 0x3ac   :  { %v529_v37 = vpop.f32.mrf.mxu2  ;;  %v380_v38 = vpop.f32.mrf.mxu0 }
 0x3ad   :  { %539 = vrot.lane.b32.xlu1 %v380_v38, %s921_s30 }
 0x3b0   :  { %v453_v40 = vpop.f32.mrf.mxu1 }
 0x3b4   :  { %v532_v39 = vpop.f32.mrf.mxu2 }
 0x3b5   :  { %555 = vrot.lane.b32.xlu2 %v532_v39, %s931_s22  ;;  %545 = vrot.lane.b32.xlu1 %v453_v40, %s932_s23 }
 0x3d5   :  { %v456_v41 = vpop.f32.mrf.mxu1 }
 0x3d6   :  { %547 = vrot.lane.b32.xlu0 %v456_v41, %s932_s23 }
 0x3d7   :  { %v301_v42 = vpop.f32.mrf.mxu3 }
 0x3de   :  { %537 = vrot.lane.b32.xlu0 %v377_v36, %s921_s30 }
 0x3e6   :  { %553 = vrot.lane.b32.xlu0 %v529_v37, %s931_s22 }
 0x3f3   :  { %v304_v44 = vpop.f32.mrf.mxu3 }
 0x40f   :  { %v556_v48 = vpop.permute.xlu2 %555 }
 0x41f   :  { %v540_v43 = vpop.permute.xlu1 %539 }
 0x420   :  { %v561_v46 = vsel %vm559_vm0, %v304_v44, %v540_v43 }
 0x427   :  { %v546_v26 = vpop.permute.xlu1 %545 }
 0x448   :  { %v548_v47 = vpop.permute.xlu0 %547 }
 0x449   :  { %v563_v49 = vsel %vm255_vm8, %v561_v46, %v548_v47 }
 0x44a   :  { %v566_v50 = vsel %vm564_vm1, %v563_v49, %v556_v48 }
 0x44b   :  { %v572_v51 = vadd.f32 %v772_v45, %v566_v50 }
 0x44d   :  { %v577_v54 = vmul.f32 1.442695, %v572_v51  ;;  %vm574_vm3 = vcmp.gt.f32.partialorder %v572_v51, 0.0 }
 0x44f   :  { %809 = vpow2.f32 %v577_v54 }
 0x450   :  { %v538_v55 = vpop.permute.xlu0 %537 }
 0x451   :  { %v560_v57 = vsel %vm559_vm0, %v301_v42, %v538_v55 }
 0x452   :  { %v562_v27 = vsel %vm255_vm8, %v560_v57, %v546_v26 }
 0x455   :  { %v810_v56 = vpop.eup %809 }
 0x456   :  { %v726_v58 = vadd.f32 -1.0, %v810_v56 }
 0x458   :  { %v554_v59 = vpop.permute.xlu0 %553  ;;  %v582_v60 = vsel %vm574_vm3, %v572_v51, %v726_v58 }
 0x459   :  { %v565_v61 = vsel %vm564_vm1, %v562_v27, %v554_v59  ;;  %727 = vmatpush.xpose.msk.msra.mxu3 %vm143_vm2, %v582_v60 }
 0x45a   :  { %v571_v62 = vadd.f32 %v772_v45, %v565_v61 }
 0x45c   :  { %v575_v63 = vmul.f32 1.442695, %v571_v62  ;;  %vm573_vm4 = vcmp.gt.f32.partialorder %v571_v62, 0.0 }
 0x45e   :  { %811 = vpow2.f32 %v575_v63 }
 0x464   :  { %v812_v0 = vpop.eup %811 }
 0x465   :  { %v725_v1 = vadd.f32 -1.0, %v812_v0 }
 0x467   :  { %v581_v2 = vsel %vm573_vm4, %v571_v62, %v725_v1 }
 0x468   :  { %728 = vmatpush.xpose.msk.msra.mxu3 %vm143_vm2, %v581_v2 }
 0x46b   :  { %729 = vmatmul.msk.f32.vlgmr.msra.gmra.mxu3 %vm143_vm2, %v583_v3 }
 0x4ee   :  { %v610_v6 = vpop.f32.mrf.mxu3 }
 0x4ef   :  { %v618_v7 = vrot.slane %v610_v6, 1  ;;  %731 = vmatmul.msk.f32.vlgmr.msra.gmra.mxu1 %vm255_vm8, %v610_v6 }
 0x4f1   :  { %730 = vmatmul.msk.f32.vlgmr.msra.gmra.mxu0 %vm255_vm8, %v618_v7 }
 0x56c   :  { %v660_v9 = vpop.f32.mrf.mxu1 }
 0x56e   :  { %v638_v8 = vpop.f32.mrf.mxu0 }
 0x56f   :  { %v661_v11 = vadd.f32 %v660_v9, %v638_v8 }
 0x571   :  { %v665_v12 = vadd.f32 %v664_v10, %v661_v11 }
 0x573   :  { %v666_v13 = vsub.f32 0.0, %v665_v12 }
 0x575   :  { %v667_v14 = vmul.f32 1.442695, %v666_v13 }
 0x577   :  { %813 = vpow2.f32 %v667_v14 }
 0x57d   :  { %v814_v15 = vpop.eup %813 }
 0x57e   :  { %v669_v16 = vadd.f32 1.0, %v814_v15 }
 0x580   :  { %815 = vrcp.f32 %v669_v16  ;;  %v681_v20 = vand.u32 2147483648, %v669_v16  ;;  %v679_v22 = vand.u32 2147483647, %v669_v16  ;;  %vm675_vm5 = vweird.f32 %v669_v16 }
 0x582   :  { %v682_v24 = vor.u32 1.1754944e-38, %v681_v20  ;;  %vm680_vm8 = vcmp.eq.f32.partialorder %v679_v22, 8.507059e+37 }
 0x586   :  { %v816_v17 = vpop.eup %815 }
 0x587   :  { %v671_v18 = vmul.f32 %v816_v17, %v669_v16  ;;  %vm676_vm2 = vweird.f32 %v816_v17 }
 0x588   :  { %vm677_vm6 = vmor %vm675_vm5, %vm676_vm2 }
 0x589   :  { %v672_v19 = vsub.f32 1.0, %v671_v18 }
 0x58b   :  { %v673_v21 = vmul.f32 %v816_v17, %v672_v19 }
 0x58d   :  { %v674_v23 = vadd.f32 %v816_v17, %v673_v21 }
 0x58f   :  { %v678_v25 = vsel %vm677_vm6, %v816_v17, %v674_v23 }
 0x590   :  { %v683_v28 = vsel %vm680_vm8, %v682_v24, %v678_v25 }
 0x591   :  { %686 = vst.msk [vmem:[#allocation9] sm:$0x1] %vm685_vm7, %v683_v28 }
 0x592   :  { %697 = dma.vmem_to_hbm [thread:$0]  %s693_s27, 16, %s695_s11, [#allocation5]  }
 0x593   :  { %917 = dma.done.wait [#allocation5], 16  }
 0x594   :  { %918 = vsyncadd [#allocation5], 4294967280 }
 0x595   :  { %702 = vsyncpa [#allocation4], 1 }
 0x596   :  { %703 = vsyncpa [#allocation7], 1 }
 0x597   :  { %704 = vsyncpa [#allocation5], 1 }

</bundles_post_ra>
